<compile_context>
chip_gen: v7x
topology: tpu7x:2x2x1
jax: 0.10.0
libtpu: 0.0.40
codegen_flags: <defaults>
</compile_context>

<pallas_src>
import jax
import jax.numpy as jnp
from jax import lax
from jax.experimental import pallas as pl
from jax.experimental.pallas import tpu as pltpu


def _round_up(x, m):
    return ((x + m - 1) // m) * m


def language_gate_kernel(x_ref, xres_ref, w1_ref, w2_ref, o_ref, acc_ref):
    k = pl.program_id(1)

    @pl.when(k == 0)
    def _init():
        acc_ref[...] = jnp.zeros_like(acc_ref)

    xres = xres_ref[...]

    # h_chunk = relu(xres @ W1[kchunk, :]^T)  -> (TM, TK)
    # (contract last dims of both operands — no transpose materialized)
    h = lax.dot_general(
        xres,
        w1_ref[...],
        dimension_numbers=(((1,), (1,)), ((), ())),
        preferred_element_type=jnp.float32,
    )
    h = jnp.maximum(h, 0.0)

    # acc += h_chunk @ W2[:, kchunk]^T  -> (TM, D)
    acc_ref[...] += lax.dot_general(
        h.astype(w2_ref.dtype),
        w2_ref[...],
        dimension_numbers=(((1,), (1,)), ((), ())),
        preferred_element_type=jnp.float32,
    )

    @pl.when(k == pl.num_programs(1) - 1)
    def _finalize():
        g = jnp.tanh(acc_ref[...])  # EUP slot; effectively free next to MXU/VPU
        o_ref[...] = (
            x_ref[...].astype(jnp.float32) + g * xres.astype(jnp.float32)
        ).astype(o_ref.dtype)


def language_gate(x, x_residual, w1, w2, *, tm=256, tk=512,
                  vmem_budget=40 * 1024 * 1024):
    """x, x_residual: (B, D); w1, w2: (D, D) in PyTorch Linear (out, in) layout."""
    B, D = x.shape
    assert x_residual.shape == (B, D)
    assert w1.shape == (D, D) and w2.shape == (D, D)

    # --- pad to TPU-friendly tile sizes -------------------------------------
    D_pad = _round_up(D, 128)                  # lane-dense stores / MXU alignment
    tm = min(tm, _round_up(B, 8))              # sublane-aligned batch tile
    tk = max(128, (min(tk, D_pad) // 128) * 128)
    while D_pad % tk != 0:                     # tk must divide D_pad (stays 128-mult)
        tk -= 128

    xbytes = x.dtype.itemsize
    wbytes = w1.dtype.itemsize

    def footprint(tm_, tk_):
        # double-buffered x / xres / out tiles + W1/W2 chunks, plus f32 accumulator
        return (2 * (3 * tm_ * D_pad * xbytes + 2 * tk_ * D_pad * wbytes)
                + tm_ * D_pad * 4)

    # Shrink tk first (more k steps, same arithmetic), then tm, to fit VMEM.
    while footprint(tm, tk) > vmem_budget and tk > 128:
        tk -= 128
        while D_pad % tk != 0:
            tk -= 128
    while footprint(tm, tk) > vmem_budget and tm > 8:
        tm -= 8

    B_pad = _round_up(B, tm)

    if (B_pad, D_pad) != (B, D):
        x = jnp.pad(x, ((0, B_pad - B), (0, D_pad - D)))
        x_residual = jnp.pad(x_residual, ((0, B_pad - B), (0, D_pad - D)))
    if D_pad != D:
        w1 = jnp.pad(w1, ((0, D_pad - D), (0, D_pad - D)))
        w2 = jnp.pad(w2, ((0, D_pad - D), (0, D_pad - D)))

    grid = (B_pad // tm, D_pad // tk)

    cost = pl.CostEstimate(
        flops=4 * B_pad * D_pad * D_pad,                   # two (B,D)x(D,D) matmuls
        transcendentals=B_pad * D_pad,                     # tanh
        bytes_accessed=(grid[0] * 2 * D_pad * D_pad * wbytes
                        + 3 * B_pad * D_pad * xbytes),
    )

    out = pl.pallas_call(
        language_gate_kernel,
        out_shape=jax.ShapeDtypeStruct((B_pad, D_pad), x.dtype),
        grid_spec=pltpu.PrefetchScalarGridSpec(
            num_scalar_prefetch=0,
            grid=grid,
            in_specs=[
                pl.BlockSpec((tm, D_pad), lambda m, k: (m, 0)),   # x (resident over k)
                pl.BlockSpec((tm, D_pad), lambda m, k: (m, 0)),   # x_residual
                pl.BlockSpec((tk, D_pad), lambda m, k: (k, 0)),   # W1 rows = hidden chunk
                pl.BlockSpec((D_pad, tk), lambda m, k: (0, k)),   # W2 cols = hidden chunk
            ],
            out_specs=pl.BlockSpec((tm, D_pad), lambda m, k: (m, 0)),
            scratch_shapes=[pltpu.VMEM((tm, D_pad), jnp.float32)],
        ),
        compiler_params=pltpu.CompilerParams(
            dimension_semantics=("parallel", "arbitrary"),
            vmem_limit_bytes=48 * 1024 * 1024,   # headroom on v5e/v6e/v7x
        ),
        cost_estimate=cost,
    )(x, x_residual, w1, w2)

    return out[:B, :D]


def reference(x, x_residual, w1, w2):
    h = jnp.maximum(x_residual @ w1.T, 0.0)
    g = jnp.tanh(h @ w2.T)
    return x + g * x_residual


if __name__ == "__main__":
    B, D = 2, 32  # batch_size, dim (small demo shapes; kernel pads internally)

    key = jax.random.PRNGKey(0)
    k_x, k_r, k_w1, k_w2 = jax.random.split(key, 4)

    x = jax.random.normal(k_x, (B, D), dtype=jnp.float32)
    x_residual = jax.random.normal(k_r, (B, D), dtype=jnp.float32)

    # Deterministic nn.Linear-style init: U(-1/sqrt(dim), 1/sqrt(dim)), shape (out, in)
    bound = 1.0 / (D ** 0.5)
    w1 = jax.random.uniform(k_w1, (D, D), dtype=jnp.float32, minval=-bound, maxval=bound)
    w2 = jax.random.uniform(k_w2, (D, D), dtype=jnp.float32, minval=-bound, maxval=bound)

    out = language_gate(x, x_residual, w1, w2)
    out = jax.block_until_ready(out)

    ref = reference(x, x_residual, w1, w2)
    assert out.shape == (B, D)
    assert jnp.allclose(out, ref, atol=1e-5, rtol=1e-5), "mismatch vs reference"

    print("KERNEL_OK")
</pallas_src>

<mosaic_0001>
module attributes {stable_mosaic.version = 11 : i64} {
  func.func @language_gate_kernel(%arg0: i32, %arg1: i32, %arg2: memref<8x128xf32, #tpu.memory_space<vmem>>, %arg3: memref<8x128xf32, #tpu.memory_space<vmem>>, %arg4: memref<128x128xf32, #tpu.memory_space<vmem>>, %arg5: memref<128x128xf32, #tpu.memory_space<vmem>>, %arg6: memref<8x128xf32, #tpu.memory_space<vmem>>, %arg7: memref<8x128xf32, #tpu.memory_space<vmem>>) attributes {dimension_semantics = [#tpu.dimension_semantics<parallel>, #tpu.dimension_semantics<arbitrary>], iteration_bounds = array<i64: 1, 1>, scalar_prefetch = 0 : i64, scratch_operands = 1 : i64, tpu.core_type = #tpu.core_type<tc>, window_params = [{transform_indices = @transform_0, window_bounds = array<i64: 8, 128>}, {transform_indices = @transform_1, window_bounds = array<i64: 8, 128>}, {transform_indices = @transform_2, window_bounds = array<i64: 128, 128>}, {transform_indices = @transform_3, window_bounds = array<i64: 128, 128>}, {transform_indices = @transform_4, window_bounds = array<i64: 8, 128>}]} {
    %c0_i32 = arith.constant 0 : i32
    %0 = arith.cmpi eq, %arg1, %c0_i32 : i32
    %1 = arith.extui %0 : i1 to i32
    %c0_i32_0 = arith.constant 0 : i32
    %2 = arith.cmpi ne, %1, %c0_i32_0 : i32
    scf.if %2 {
      %cst_14 = arith.constant 0.000000e+00 : f32
      %16 = vector.broadcast %cst_14 : f32 to vector<8x128xf32>
      %c0_15 = arith.constant 0 : index
      %c0_16 = arith.constant 0 : index
      %17 = vector.load %arg7[%c0_15, %c0_16] : memref<8x128xf32, #tpu.memory_space<vmem>>, vector<8x128xf32>
      tpu.vector_store %arg7[%c0_15, %c0_16], %16 {strides = array<i32>} : memref<8x128xf32, #tpu.memory_space<vmem>>, vector<8x128xf32>,
    } else {
    }
    %c0 = arith.constant 0 : index
    %c0_1 = arith.constant 0 : index
    %3 = vector.load %arg3[%c0, %c0_1] : memref<8x128xf32, #tpu.memory_space<vmem>>, vector<8x128xf32>
    %c0_2 = arith.constant 0 : index
    %c0_3 = arith.constant 0 : index
    %4 = vector.load %arg4[%c0_2, %c0_3] : memref<128x128xf32, #tpu.memory_space<vmem>>, vector<128x128xf32>
    %cst = arith.constant dense<0.000000e+00> : vector<8x128xf32>
    %5 = tpu.matmul %3, %4, %cst {dimension_numbers = #tpu.dot_dimension_numbers<[1], [1], [0], [0], [0, 0, 1, 0], [], []>} : vector<8x128xf32>, vector<128x128xf32>, vector<8x128xf32> -> vector<8x128xf32>
    %cst_4 = arith.constant 0.000000e+00 : f32
    %6 = vector.broadcast %cst_4 : f32 to vector<8x128xf32>
    %7 = arith.maximumf %5, %6 : vector<8x128xf32>
    %c0_5 = arith.constant 0 : index
    %c0_6 = arith.constant 0 : index
    %8 = vector.load %arg7[%c0_5, %c0_6] : memref<8x128xf32, #tpu.memory_space<vmem>>, vector<8x128xf32>
    %c0_7 = arith.constant 0 : index
    %c0_8 = arith.constant 0 : index
    %9 = vector.load %arg5[%c0_7, %c0_8] : memref<128x128xf32, #tpu.memory_space<vmem>>, vector<128x128xf32>
    %cst_9 = arith.constant dense<0.000000e+00> : vector<8x128xf32>
    %10 = tpu.matmul %7, %9, %cst_9 {dimension_numbers = #tpu.dot_dimension_numbers<[1], [1], [0], [0], [0, 0, 1, 0], [], []>} : vector<8x128xf32>, vector<128x128xf32>, vector<8x128xf32> -> vector<8x128xf32>
    %11 = arith.addf %8, %10 : vector<8x128xf32>
    %c0_10 = arith.constant 0 : index
    %c0_11 = arith.constant 0 : index
    %12 = vector.load %arg7[%c0_10, %c0_11] : memref<8x128xf32, #tpu.memory_space<vmem>>, vector<8x128xf32>
    tpu.vector_store %arg7[%c0_10, %c0_11], %11 {strides = array<i32>} : memref<8x128xf32, #tpu.memory_space<vmem>>, vector<8x128xf32>,
    %c0_i32_12 = arith.constant 0 : i32
    %13 = arith.cmpi eq, %arg1, %c0_i32_12 : i32
    %14 = arith.extui %13 : i1 to i32
    %c0_i32_13 = arith.constant 0 : i32
    %15 = arith.cmpi ne, %14, %c0_i32_13 : i32
    scf.if %15 {
      %c0_14 = arith.constant 0 : index
      %c0_15 = arith.constant 0 : index
      %16 = vector.load %arg7[%c0_14, %c0_15] : memref<8x128xf32, #tpu.memory_space<vmem>>, vector<8x128xf32>
      %17 = math.tanh %16 : vector<8x128xf32>
      %c0_16 = arith.constant 0 : index
      %c0_17 = arith.constant 0 : index
      %18 = vector.load %arg2[%c0_16, %c0_17] : memref<8x128xf32, #tpu.memory_space<vmem>>, vector<8x128xf32>
      %19 = arith.mulf %17, %3 : vector<8x128xf32>
      %20 = arith.addf %18, %19 : vector<8x128xf32>
      %c0_18 = arith.constant 0 : index
      %c0_19 = arith.constant 0 : index
      %21 = vector.load %arg6[%c0_18, %c0_19] : memref<8x128xf32, #tpu.memory_space<vmem>>, vector<8x128xf32>
      tpu.vector_store %arg6[%c0_18, %c0_19], %20 {strides = array<i32>} : memref<8x128xf32, #tpu.memory_space<vmem>>, vector<8x128xf32>,
    } else {
    }
    return
  }
  func.func @transform_0(%arg0: i32, %arg1: i32) -> (i32, i32) {
    %c0_i32 = arith.constant 0 : i32
    %c0_i32_0 = arith.constant 0 : i32
    return %arg0, %c0_i32 : i32, i32
  }
  func.func @transform_1(%arg0: i32, %arg1: i32) -> (i32, i32) {
    %c0_i32 = arith.constant 0 : i32
    %c0_i32_0 = arith.constant 0 : i32
    return %arg0, %c0_i32 : i32, i32
  }
  func.func @transform_2(%arg0: i32, %arg1: i32) -> (i32, i32) {
    %c0_i32 = arith.constant 0 : i32
    %c0_i32_0 = arith.constant 0 : i32
    return %arg1, %c0_i32 : i32, i32
  }
  func.func @transform_3(%arg0: i32, %arg1: i32) -> (i32, i32) {
    %c0_i32 = arith.constant 0 : i32
    %c0_i32_0 = arith.constant 0 : i32
    return %c0_i32, %arg1 : i32, i32
  }
  func.func @transform_4(%arg0: i32, %arg1: i32) -> (i32, i32) {
    %c0_i32 = arith.constant 0 : i32
    %c0_i32_0 = arith.constant 0 : i32
    return %arg0, %c0_i32 : i32, i32
  }
}

</mosaic_0001>

<bundles_post_ra>
// kernel: tpu_custom_call.1
= control target key start
LH: loop header
LB: loop body
LE: loop exit
PB: predicated region body
PF: predicated region fallthrough
CT: control target
= control target key end

     0   :  { %9 = vsyncpa [#allocation4], 0  ;;  %s670_s0 = inlined_call_operand.hbm [shape: f32[8,128], index: 0, kind: input, shape index: {}]   ;;  %s671_s1 = inlined_call_operand.hbm [shape: f32[8,128], index: 1, kind: input, shape index: {}]   ;;  %s672_s2 = inlined_call_operand.hbm [shape: f32[128,128], index: 2, kind: input, shape index: {}]   ;;  %s673_s3 = inlined_call_operand.hbm [shape: f32[128,128], index: 3, kind: input, shape index: {}]   ;;  %s674_s4 = inlined_call_operand.hbm [shape: f32[8,128], index: 4, kind: output, shape index: {}]  }
   0x1   :  { %10 = vsyncpa [#allocation7], 0 }
   0x2   :  { %11 = vsyncpa [#allocation10], 0 }
   0x3   :  { %12 = vsyncpa [#allocation5], 0  ;;  %s559_s15 = smov [#allocation6]   ;;  %s560_s17 = smov [#allocation3]  }
   0x4   :  { %s29_s16 = sshll.u32 %s559_s15, 4  ;;  %s19_s18 = sshll.u32 %s560_s17, 4  ;;  %s30_s16 = int_to_ptr.vmem [resolvable:$true] %s29_s16  ;;  %s20_s18 = int_to_ptr.vmem [resolvable:$true] %s19_s18 }
   0x5   :  { %s441_s21 = scalar_lea.hbm %s671_s1, 128 }
   0x6   :  { %p442_p0 = scmp.ne.s32.totalorder %s671_s1, %s441_s21  ;;  %p445_p1 = scmp.lt.u32.totalorder %s441_s21, %s671_s1 }
   0x8   :  { %p447_p2 = pnand %p445_p1, %p442_p0 }
   0xa   :  { %450 = shalt.err (!%p447_p2)
}
   0xb   :  { %s451_s26 = scalar_lea.vmem %s30_s16, 128  ;;  %p456_p4 = scmp.lt.s32.totalorder %s30_s16, %s30_s16 }
   0xc   :  { %p452_p3 = scmp.ne.s32.totalorder %s30_s16, %s451_s26  ;;  %p457_p5 = scmp.lt.s32.totalorder %s451_s26, %s451_s26 }
   0xe   :  { %p458_p6 = por %p457_p5, %p456_p4 }
  0x10   :  { %p459_p7 = pnand %p458_p6, %p452_p3 }
  0x12   :  { %462 = shalt.err (!%p459_p7)
}
  0x13   :  { %32 = dma.hbm_to_vmem [thread:$0]  %s671_s1, 128, %s30_s16, [#allocation7]  }
  0x14   :  { %s463_s5 = scalar_lea.hbm %s670_s0, 128 }
  0x15   :  { %p464_p8 = scmp.ne.s32.totalorder %s670_s0, %s463_s5  ;;  %p467_p9 = scmp.lt.u32.totalorder %s463_s5, %s670_s0 }
  0x17   :  { %p469_p10 = pnand %p467_p9, %p464_p8 }
  0x19   :  { %472 = shalt.err (!%p469_p10)
}
  0x1a   :  { %s473_s10 = scalar_lea.vmem %s20_s18, 128  ;;  %p478_p12 = scmp.lt.s32.totalorder %s20_s18, %s20_s18 }
  0x1b   :  { %p474_p11 = scmp.ne.s32.totalorder %s20_s18, %s473_s10  ;;  %p479_p13 = scmp.lt.s32.totalorder %s473_s10, %s473_s10 }
  0x1d   :  { %p480_p0 = por %p479_p13, %p478_p12 }
  0x1f   :  { %p481_p1 = pnand %p480_p0, %p474_p11 }
  0x21   :  { %484 = shalt.err (!%p481_p1)
}
  0x22   :  { %22 = dma.hbm_to_vmem [thread:$0]  %s670_s0, 128, %s20_s18, [#allocation4]  }
  0x23   :  { %s561_s12 = smov [#allocation8]   ;;  %s485_s16 = scalar_lea.hbm %s672_s2, 2048 }
  0x24   :  { %s38_s13 = sshll.u32 %s561_s12, 4  ;;  %p486_p2 = scmp.ne.s32.totalorder %s672_s2, %s485_s16  ;;  %s39_s13 = int_to_ptr.vmem [resolvable:$true] %s38_s13 }
  0x25   :  { %p489_p3 = scmp.lt.u32.totalorder %s485_s16, %s672_s2 }
  0x27   :  { %p491_p4 = pnand %p489_p3, %p486_p2 }
  0x29   :  { %494 = shalt.err (!%p491_p4)
}
  0x2a   :  { %s495_s22 = scalar_lea.vmem %s39_s13, 2048  ;;  %p500_p6 = scmp.lt.s32.totalorder %s39_s13, %s39_s13 }
  0x2b   :  { %p496_p5 = scmp.ne.s32.totalorder %s39_s13, %s495_s22  ;;  %p501_p7 = scmp.lt.s32.totalorder %s495_s22, %s495_s22 }
  0x2d   :  { %p502_p8 = por %p501_p7, %p500_p6 }
  0x2f   :  { %p503_p9 = pnand %p502_p8, %p496_p5 }
  0x31   :  { %506 = shalt.err (!%p503_p9)
}
  0x32   :  { %s562_s0 = smov 128   ;;  %s563_s18 = smov 8  }
  0x33   :  { %44 = dma.hbm_to_vmem [thread:$0]  %s672_s2, 2048, %s39_s13, [#allocation7], %s562_s0, %s562_s0, %s563_s18  }
  0x34   :  { %s564_s25 = smov [#allocation9]   ;;  %s507_s29 = scalar_lea.hbm %s673_s3, 2048 }
  0x35   :  { %s50_s26 = sshll.u32 %s564_s25, 4  ;;  %p508_p10 = scmp.ne.s32.totalorder %s673_s3, %s507_s29  ;;  %s51_s26 = int_to_ptr.vmem [resolvable:$true] %s50_s26 }
  0x36   :  { %p511_p11 = scmp.lt.u32.totalorder %s507_s29, %s673_s3 }
  0x38   :  { %p513_p12 = pnand %p511_p11, %p508_p10 }
  0x3a   :  { %516 = shalt.err (!%p513_p12)
}
  0x3b   :  { %s517_s8 = scalar_lea.vmem %s51_s26, 2048  ;;  %p522_p0 = scmp.lt.s32.totalorder %s51_s26, %s51_s26 }
  0x3c   :  { %p518_p13 = scmp.ne.s32.totalorder %s51_s26, %s517_s8  ;;  %p523_p1 = scmp.lt.s32.totalorder %s517_s8, %s517_s8 }
  0x3e   :  { %p524_p2 = por %p523_p1, %p522_p0 }
  0x40   :  { %p525_p3 = pnand %p524_p2, %p518_p13 }
  0x42   :  { %528 = shalt.err (!%p525_p3)
}
  0x43   :  { %56 = dma.hbm_to_vmem [thread:$0]  %s673_s3, 2048, %s51_s26, [#allocation10], %s562_s0, %s562_s0, %s563_s18  }
  0x44   :  { %551 = dma.done.wait [#allocation4], 128  }
  0x45   :  { %552 = vsyncadd [#allocation4], 4294967168 }
  0x46   :  { %553 = dma.done.wait [#allocation7], 2176  }
  0x47   :  { %554 = vsyncadd [#allocation7], 4294965120 }
  0x48   :  { %555 = dma.done.wait [#allocation10], 2048  }
  0x49   :  { %556 = vsyncadd [#allocation10], 4294965248  ;;  %v565_v0 = vmov 0.0|0.0   ;;  %vm566_vm0 = vmmov 0   ;;  %v567_v1 = vmov 0.0   ;;  %v75_v2 = vld [vmem:[#allocation8] sm:$0xff] }
  0x4a   :  { %381 = vmatprep.subr.bf16.mxu0 %v565_v0  ;;  %343 = vmatprep.mubr.msk.f32.mxu0 %vm566_vm0, %v567_v1  ;;  %v76_v3 = vld [vmem:[#allocation8 + $0x8] sm:$0xff]  ;;  %v77_v5 = vld [vmem:[#allocation8 + $0x10] sm:$0xff]  ;;  %v78_v6 = vld [vmem:[#allocation8 + $0x18] sm:$0xff]  ;;  %s568_s3 = smov [#allocation11]  }
  0x4b   :  { %405 = vmatprep.subr.bf16.mxu1 %v565_v0  ;;  %378 = vmatprep.mubr.msk.f32.mxu1 %vm566_vm0, %v567_v1  ;;  %v382_v4 = vpack.c.bf16 %v76_v3, %v75_v2  ;;  %v163_v7 = vld [vmem:[#allocation9] sm:$0xff]  ;;  %v164_v8 = vld [vmem:[#allocation9 + $0x8] sm:$0xff]  ;;  %v385_v9 = vpack.c.bf16 %v78_v6, %v77_v5  ;;  %v165_v11 = vld [vmem:[#allocation9 + $0x10] sm:$0xff]  ;;  %s266_s10 = sshll.u32 %s568_s3, 4  ;;  %s267_s10 = int_to_ptr.vmem [resolvable:$true] %s266_s10 }
  0x4c   :  { %v406_v10 = vpack.c.bf16 %v164_v8, %v163_v7  ;;  %v166_v12 = vld [vmem:[#allocation9 + $0x18] sm:$0xff]  ;;  %v79_v13 = vld [vmem:[#allocation8 + $0x20] sm:$0xff]  ;;  %v80_v14 = vld [vmem:[#allocation8 + $0x28] sm:$0xff]  ;;  %s529_s1 = scalar_lea.vmem %s267_s10, 128  ;;  %p534_p5 = scmp.lt.s32.totalorder %s267_s10, %s267_s10 }
  0x4d   :  { %383 = vmatpush3.bf16.xpose.msra.mxu0 %v382_v4  ;;  %v409_v15 = vpack.c.bf16 %v166_v12, %v165_v11  ;;  %v388_v16 = vpack.c.bf16 %v80_v14, %v79_v13  ;;  %v167_v17 = vld [vmem:[#allocation9 + $0x20] sm:$0xff]  ;;  %v168_v18 = vld [vmem:[#allocation9 + $0x28] sm:$0xff]  ;;  %v81_v19 = vld [vmem:[#allocation8 + $0x30] sm:$0xff]  ;;  %p530_p4 = scmp.ne.s32.totalorder %s267_s10, %s529_s1  ;;  %p535_p6 = scmp.lt.s32.totalorder %s529_s1, %s529_s1 }
  0x4e   :  { %384 = vmatprep.subr.bf16.mxu0 %v565_v0  ;;  %407 = vmatpush3.bf16.xpose.msra.mxu1 %v406_v10  ;;  %v82_v20 = vld [vmem:[#allocation8 + $0x38] sm:$0xff]  ;;  %v412_v21 = vpack.c.bf16 %v168_v18, %v167_v17  ;;  %v169_v23 = vld [vmem:[#allocation9 + $0x30] sm:$0xff]  ;;  %v83_v25 = vld [vmem:[#allocation8 + $0x40] sm:$0xff] }
  0x4f   :  { %408 = vmatprep.subr.bf16.mxu1 %v565_v0  ;;  %v391_v22 = vpack.c.bf16 %v82_v20, %v81_v19  ;;  %v170_v24 = vld [vmem:[#allocation9 + $0x38] sm:$0xff]  ;;  %v84_v26 = vld [vmem:[#allocation8 + $0x48] sm:$0xff]  ;;  %v171_v29 = vld [vmem:[#allocation9 + $0x40] sm:$0xff]  ;;  %p536_p7 = por %p535_p6, %p534_p5 }
  0x50   :  { %v415_v27 = vpack.c.bf16 %v170_v24, %v169_v23  ;;  %v394_v28 = vpack.c.bf16 %v84_v26, %v83_v25  ;;  %v172_v30 = vld [vmem:[#allocation9 + $0x48] sm:$0xff]  ;;  %v85_v31 = vld [vmem:[#allocation8 + $0x50] sm:$0xff]  ;;  %v86_v32 = vld [vmem:[#allocation8 + $0x58] sm:$0xff] }
  0x51   :  { %v418_v33 = vpack.c.bf16 %v172_v30, %v171_v29  ;;  %v397_v34 = vpack.c.bf16 %v86_v32, %v85_v31  ;;  %v173_v35 = vld [vmem:[#allocation9 + $0x50] sm:$0xff]  ;;  %v174_v36 = vld [vmem:[#allocation9 + $0x58] sm:$0xff]  ;;  %v87_v37 = vld [vmem:[#allocation8 + $0x60] sm:$0xff]  ;;  %p537_p8 = pnand %p536_p7, %p530_p4 }
  0x52   :  { %v88_v38 = vld [vmem:[#allocation8 + $0x68] sm:$0xff]  ;;  %v421_v39 = vpack.c.bf16 %v174_v36, %v173_v35  ;;  %v175_v41 = vld [vmem:[#allocation9 + $0x60] sm:$0xff]  ;;  %v89_v43 = vld [vmem:[#allocation8 + $0x70] sm:$0xff] }
  0x53   :  { %v400_v40 = vpack.c.bf16 %v88_v38, %v87_v37  ;;  %v176_v42 = vld [vmem:[#allocation9 + $0x68] sm:$0xff]  ;;  %v90_v44 = vld [vmem:[#allocation8 + $0x78] sm:$0xff]  ;;  %v177_v47 = vld [vmem:[#allocation9 + $0x70] sm:$0xff] }
  0x54   :  { %v424_v45 = vpack.c.bf16 %v176_v42, %v175_v41  ;;  %v403_v46 = vpack.c.bf16 %v90_v44, %v89_v43  ;;  %v178_v48 = vld [vmem:[#allocation9 + $0x78] sm:$0xff]  ;;  %v256_v57 = vld [vmem:[#allocation3] sm:$0xff] }
  0x55   :  { %386 = vmatpush3.bf16.xpose.msra.mxu0 %v385_v9  ;;  %v427_v49 = vpack.c.bf16 %v178_v48, %v177_v47  ;;  %v74_v50 = vld [vmem:[#allocation6] sm:$0xff] }
  0x56   :  { %387 = vmatprep.subr.bf16.mxu0 %v565_v0  ;;  %410 = vmatpush3.bf16.xpose.msra.mxu1 %v409_v15 }
  0x57   :  { %411 = vmatprep.subr.bf16.mxu1 %v565_v0 }
  0x5d   :  { %389 = vmatpush3.bf16.xpose.msra.mxu0 %v388_v16 }
  0x5e   :  { %390 = vmatprep.subr.bf16.mxu0 %v565_v0  ;;  %413 = vmatpush3.bf16.xpose.msra.mxu1 %v412_v21 }
  0x5f   :  { %414 = vmatprep.subr.bf16.mxu1 %v565_v0 }
  0x65   :  { %392 = vmatpush3.bf16.xpose.msra.mxu0 %v391_v22 }
  0x66   :  { %393 = vmatprep.subr.bf16.mxu0 %v565_v0  ;;  %416 = vmatpush3.bf16.xpose.msra.mxu1 %v415_v27 }
  0x67   :  { %417 = vmatprep.subr.bf16.mxu1 %v565_v0 }
  0x6d   :  { %395 = vmatpush3.bf16.xpose.msra.mxu0 %v394_v28 }
  0x6e   :  { %396 = vmatprep.subr.bf16.mxu0 %v565_v0  ;;  %419 = vmatpush3.bf16.xpose.msra.mxu1 %v418_v33 }
  0x6f   :  { %420 = vmatprep.subr.bf16.mxu1 %v565_v0 }
  0x75   :  { %398 = vmatpush3.bf16.xpose.msra.mxu0 %v397_v34 }
  0x76   :  { %399 = vmatprep.subr.bf16.mxu0 %v565_v0  ;;  %422 = vmatpush3.bf16.xpose.msra.mxu1 %v421_v39 }
  0x77   :  { %423 = vmatprep.subr.bf16.mxu1 %v565_v0 }
  0x7d   :  { %401 = vmatpush3.bf16.xpose.msra.mxu0 %v400_v40 }
  0x7e   :  { %402 = vmatprep.subr.bf16.mxu0 %v565_v0  ;;  %425 = vmatpush3.bf16.xpose.msra.mxu1 %v424_v45 }
  0x7f   :  { %426 = vmatprep.subr.bf16.mxu1 %v565_v0 }
  0x85   :  { %404 = vmatpush3.bf16.xpose.msra.mxu0 %v403_v46 }
  0x86   :  { %428 = vmatpush3.bf16.xpose.msra.mxu1 %v427_v49 }
  0x8c   :  { %344 = vmatmul.mubr.f32.vlgmr.msra.gmra.mrb[0].mxu0 %v74_v50 }
 0x15f   :  { %v157_v51 = vpop.f32.mrb[0].mxu0 }
 0x160   :  { %v161_v52 = vmax.f32 %v157_v51, 0.0  ;;  %v345_v53 = vpop.f32.mrb[1].mxu0 }
 0x162   :  { %379 = vmatmul.mubr.f32.vlgmr.msra.gmra.mrb[0].mxu1 %v161_v52 }
 0x235   :  { %v245_v54 = vpop.f32.mrb[0].mxu1 }
 0x236   :  { %439 = vtanh.f32 %v245_v54  ;;  %v380_v55 = vpop.f32.mrb[1].mxu1 }
 0x240   :  { %v440_v56 = vpop.eup %439 }
 0x241   :  { %v257_v58 = vmul.f32 %v440_v56, %v74_v50 }
 0x243   :  { %v258_v59 = vadd.f32 %v257_v58, %v256_v57 }
 0x245   :  { %259 = vst [vmem:[#allocation11] sm:$0xff] %v258_v59 }
 0x246   :  { %540 = shalt.err (!%p537_p8)
}
 0x247   :  { %s541_s13 = scalar_lea.hbm %s674_s4, 128 }
 0x248   :  { %p542_p9 = scmp.ne.s32.totalorder %s674_s4, %s541_s13  ;;  %p545_p10 = scmp.lt.u32.totalorder %s541_s13, %s674_s4 }
 0x24a   :  { %p547_p11 = pnand %p545_p10, %p542_p9 }
 0x24c   :  { %550 = shalt.err (!%p547_p11)
}
 0x24d   :  { %269 = dma.vmem_to_hbm [thread:$0]  %s267_s10, 128, %s674_s4, [#allocation5]  }
 0x24e   :  { %557 = dma.done.wait [#allocation5], 128  }
 0x24f   :  { %558 = vsyncadd [#allocation5], 4294967168 }
 0x250   :  { %273 = vsyncpa [#allocation4], 1 }
 0x251   :  { %274 = vsyncpa [#allocation7], 1 }
 0x252   :  { %275 = vsyncpa [#allocation10], 1 }
 0x253   :  { %276 = vsyncpa [#allocation5], 1 }

</bundles_post_ra>
